<compile_context>
chip_gen: v5e
topology: v5e:2x2
jax: 0.10.0
libtpu: 0.0.40
codegen_flags: <defaults>
</compile_context>

<pallas_src>
import jax
import jax.numpy as jnp
from jax import lax
from jax.experimental import pallas as pl
from jax.experimental.pallas import tpu as pltpu


def _lti_kernel(F_ref, uQ_ref, m_ref, P_ref, vm_ref, vP_ref):
    F = F_ref[...].astype(jnp.float32)       # (Z, Z)
    uQ = uQ_ref[...].astype(jnp.float32)     # (1, Z)
    m = m_ref[...].astype(jnp.float32)       # (bB, Z)
    P = P_ref[...].astype(jnp.float32)       # (bB, Z, Z)

    bB, Z = m.shape
    # Contract lhs dim 1 with rhs dim 1  ==  "lhs @ rhs^T" without materializing rhs^T.
    contract_last = (((1,), (1,)), ((), ()))

    # velocity_m[b] = F @ m_b  ==  m @ F^T  (single MXU matmul, no explicit transpose of F).
    vm = lax.dot_general(m, F, contract_last, preferred_element_type=jnp.float32)
    vm_ref[...] = vm.astype(vm_ref.dtype)

    # P @ F^T: flatten the batch into the matmul M dimension -> one (bB*Z, Z) x (Z, Z) matmul.
    P_flat = P.reshape(bB * Z, Z)
    PFt = lax.dot_general(P_flat, F, contract_last,
                          preferred_element_type=jnp.float32).reshape(bB, Z, Z)

    # F @ P: single contraction with the batch folded into the rhs non-contracting dims.
    # Kept general (no symmetry assumption on P).
    FP = jnp.einsum('ij,bjk->bik', F, P, preferred_element_type=jnp.float32)

    # Q = diag(clamp(exp(uQ), min=1e-4)) built once as a masked select onto the diagonal.
    q = jnp.maximum(jnp.exp(uQ), 1e-4)                               # (1, Z)
    row = lax.broadcasted_iota(jnp.int32, (Z, Z), 0)
    col = lax.broadcasted_iota(jnp.int32, (Z, Z), 1)
    Qm = jnp.where(row == col, jnp.broadcast_to(q, (Z, Z)), 0.0)     # (Z, Z), diag = q

    vP_ref[...] = (FP + PFt + Qm[None]).astype(vP_ref.dtype)


def continuous_lti_forward(t, m_and_P, F, uQ, *, block_b=None):
    """Pallas equivalent of ContinuousLTI.forward(t, (m, P))."""
    del t  # unused, same as the PyTorch module
    m, P = m_and_P
    B, Z = m.shape
    uQ2 = uQ.reshape(1, Z)

    if block_b is None:
        # Tile the batch: gives a real (parallel) grid axis and keeps per-step blocks small if
        # Z grows (VMEM guard, esp. v7x's 64 MiB). Keep sublane(8)-aligned blocks for `m`.
        block_b = 8 if (B % 8 == 0) else B
    block_b = min(block_b, B)
    grid = (pl.cdiv(B, block_b),)

    vm, vP = pl.pallas_call(
        _lti_kernel,
        out_shape=(
            jax.ShapeDtypeStruct((B, Z), m.dtype),
            jax.ShapeDtypeStruct((B, Z, Z), P.dtype),
        ),
        grid_spec=pl.GridSpec(
            grid=grid,
            in_specs=[
                pl.BlockSpec((Z, Z), lambda i: (0, 0)),              # F   (replicated)
                pl.BlockSpec((1, Z), lambda i: (0, 0)),              # uQ  (replicated)
                pl.BlockSpec((block_b, Z), lambda i: (i, 0)),        # m   (batch tile)
                pl.BlockSpec((block_b, Z, Z), lambda i: (i, 0, 0)),  # P   (batch tile)
            ],
            out_specs=[
                pl.BlockSpec((block_b, Z), lambda i: (i, 0)),        # velocity_m
                pl.BlockSpec((block_b, Z, Z), lambda i: (i, 0, 0)),  # velocity_P
            ],
        ),
        compiler_params=pltpu.CompilerParams(
            # Batch tiles are independent -> sharded across the 2 TensorCores on v7x;
            # harmless (single TC) on v5e/v6e.
            dimension_semantics=("parallel",),
        ),
    )(F, uQ2, m, P)
    return vm, vP


if __name__ == "__main__":
    # Deterministic parameter / input construction (synthetic, no checkpoint).
    B_batch = 16     # batch size (e.g. trajectories x RK stages stacked by the solver)
    Z = 32           # z_dim
    # u_dim = 0 -> the control matrix B is never used in forward.

    key = jax.random.PRNGKey(0)
    k_f, k_uq, k_m, k_p = jax.random.split(key, 4)

    F = 0.1 * jax.random.normal(k_f, (Z, Z), dtype=jnp.float32)
    uQ = 0.1 * jax.random.normal(k_uq, (Z,), dtype=jnp.float32)
    m = jax.random.normal(k_m, (B_batch, Z), dtype=jnp.float32)
    A = jax.random.normal(k_p, (B_batch, Z, Z), dtype=jnp.float32)
    P = jnp.einsum('bij,bkj->bik', A, A) / Z + jnp.eye(Z)[None]  # SPD covariances
    t = jnp.zeros((1,), dtype=jnp.float32)                       # unused by forward

    vm, vP = continuous_lti_forward(t, (m, P), F, uQ)
    vm = jax.block_until_ready(vm)
    vP = jax.block_until_ready(vP)

    # Pure-JAX reference for correctness.
    q_ref = jnp.maximum(jnp.exp(uQ), 1e-4)
    Q_ref = jnp.diag(q_ref)
    vm_ref = m @ F.T
    vP_ref = (jnp.einsum('ij,bjk->bik', F, P)
              + jnp.einsum('bij,kj->bik', P, F)
              + Q_ref[None])

    assert jnp.allclose(vm, vm_ref, atol=1e-5, rtol=1e-5)
    assert jnp.allclose(vP, vP_ref, atol=1e-5, rtol=1e-5)
    print("KERNEL_OK")
</pallas_src>

<mosaic_0001>
module attributes {stable_mosaic.version = 11 : i64} {
  func.func @_lti_kernel(%arg0: i32, %arg1: memref<32x32xf32, #tpu.memory_space<vmem>>, %arg2: memref<1x32xf32, #tpu.memory_space<vmem>>, %arg3: memref<8x32xf32, #tpu.memory_space<vmem>>, %arg4: memref<8x32x32xf32, #tpu.memory_space<vmem>>, %arg5: memref<8x32xf32, #tpu.memory_space<vmem>>, %arg6: memref<8x32x32xf32, #tpu.memory_space<vmem>>) attributes {dimension_semantics = [#tpu.dimension_semantics<parallel>], iteration_bounds = array<i64: 2>, scalar_prefetch = 0 : i64, scratch_operands = 0 : i64, tpu.core_type = #tpu.core_type<tc>, window_params = [{pipeline_mode = #tpu.pipeline_mode<synchronous>, transform_indices = @transform_0, window_bounds = array<i64: 32, 32>}, {pipeline_mode = #tpu.pipeline_mode<synchronous>, transform_indices = @transform_1, window_bounds = array<i64: 1, 32>}, {transform_indices = @transform_2, window_bounds = array<i64: 8, 32>}, {transform_indices = @transform_3, window_bounds = array<i64: 8, 32, 32>}, {transform_indices = @transform_4, window_bounds = array<i64: 8, 32>}, {transform_indices = @transform_5, window_bounds = array<i64: 8, 32, 32>}]} {
    %c0 = arith.constant 0 : index
    %c0_0 = arith.constant 0 : index
    %0 = vector.load %arg1[%c0, %c0_0] : memref<32x32xf32, #tpu.memory_space<vmem>>, vector<32x32xf32>
    %c0_1 = arith.constant 0 : index
    %c0_2 = arith.constant 0 : index
    %1 = vector.load %arg2[%c0_1, %c0_2] : memref<1x32xf32, #tpu.memory_space<vmem>>, vector<1x32xf32>
    %c0_3 = arith.constant 0 : index
    %c0_4 = arith.constant 0 : index
    %2 = vector.load %arg3[%c0_3, %c0_4] : memref<8x32xf32, #tpu.memory_space<vmem>>, vector<8x32xf32>
    %c0_5 = arith.constant 0 : index
    %c0_6 = arith.constant 0 : index
    %c0_7 = arith.constant 0 : index
    %3 = vector.load %arg4[%c0_5, %c0_6, %c0_7] : memref<8x32x32xf32, #tpu.memory_space<vmem>>, vector<8x32x32xf32>
    %cst = arith.constant dense<0.000000e+00> : vector<8x32xf32>
    %4 = tpu.matmul %2, %0, %cst {dimension_numbers = #tpu.dot_dimension_numbers<[1], [1], [0], [0], [0, 0, 1, 0], [], []>} : vector<8x32xf32>, vector<32x32xf32>, vector<8x32xf32> -> vector<8x32xf32>
    %c0_8 = arith.constant 0 : index
    %c0_9 = arith.constant 0 : index
    %5 = vector.load %arg5[%c0_8, %c0_9] : memref<8x32xf32, #tpu.memory_space<vmem>>, vector<8x32xf32>
    tpu.vector_store %arg5[%c0_8, %c0_9], %4 {strides = array<i32>} : memref<8x32xf32, #tpu.memory_space<vmem>>, vector<8x32xf32>,
    %6 = vector.shape_cast %3 : vector<8x32x32xf32> to vector<256x32xf32>
    %cst_10 = arith.constant dense<0.000000e+00> : vector<256x32xf32>
    %7 = tpu.matmul %6, %0, %cst_10 {dimension_numbers = #tpu.dot_dimension_numbers<[1], [1], [0], [0], [0, 0, 1, 0], [], []>} : vector<256x32xf32>, vector<32x32xf32>, vector<256x32xf32> -> vector<256x32xf32>
    %8 = vector.shape_cast %7 : vector<256x32xf32> to vector<8x32x32xf32>
    "tpu.trace_start"() <{level = 10 : i32, message = "ij,bjk->bik"}> : () -> ()
    %cst_11 = arith.constant dense<0.000000e+00> : vector<8x32x32xf32>
    %9 = tpu.matmul %3, %0, %cst_11 {dimension_numbers = #tpu.dot_dimension_numbers<[1], [1], [0, 2], [0], [0, 0, 0, 2, 1, 0], [], []>} : vector<8x32x32xf32>, vector<32x32xf32>, vector<8x32x32xf32> -> vector<8x32x32xf32>
    %10 = tpu.transpose %9, [0, 2, 1] : vector<8x32x32xf32> -> vector<8x32x32xf32>
    "tpu.trace_stop"() : () -> ()
    %11 = math.exp %1 : vector<1x32xf32>
    %cst_12 = arith.constant 9.99999974E-5 : f32
    %12 = vector.broadcast %cst_12 : f32 to vector<1x32xf32>
    %13 = arith.maximumf %11, %12 : vector<1x32xf32>
    %14 = tpu.iota {dimensions = array<i32: 0>} : vector<32x32xi32>
    %15 = tpu.iota {dimensions = array<i32: 1>} : vector<32x32xi32>
    %16 = arith.cmpi eq, %14, %15 : vector<32x32xi32>
    %17 = vector.shape_cast %13 : vector<1x32xf32> to vector<1x32xf32>
    %18 = vector.broadcast %17 : vector<1x32xf32> to vector<32x32xf32>
    %cst_13 = arith.constant 0.000000e+00 : f32
    %19 = vector.broadcast %cst_13 : f32 to vector<32x32xf32>
    %20 = arith.select %16, %18, %19 : vector<32x32xi1>, vector<32x32xf32>
    %21 = arith.addf %10, %8 : vector<8x32x32xf32>
    %22 = vector.shape_cast %20 : vector<32x32xf32> to vector<1x32x32xf32>
    %23 = vector.broadcast %22 : vector<1x32x32xf32> to vector<8x32x32xf32>
    %24 = arith.addf %21, %23 : vector<8x32x32xf32>
    %c0_14 = arith.constant 0 : index
    %c0_15 = arith.constant 0 : index
    %c0_16 = arith.constant 0 : index
    %25 = vector.load %arg6[%c0_14, %c0_15, %c0_16] : memref<8x32x32xf32, #tpu.memory_space<vmem>>, vector<8x32x32xf32>
    tpu.vector_store %arg6[%c0_14, %c0_15, %c0_16], %24 {strides = array<i32>} : memref<8x32x32xf32, #tpu.memory_space<vmem>>, vector<8x32x32xf32>,
    return
  }
  func.func @transform_0(%arg0: i32) -> (i32, i32) {
    %c0_i32 = arith.constant 0 : i32
    %c0_i32_0 = arith.constant 0 : i32
    %c0_i32_1 = arith.constant 0 : i32
    return %c0_i32, %c0_i32_0 : i32, i32
  }
  func.func @transform_1(%arg0: i32) -> (i32, i32) {
    %c0_i32 = arith.constant 0 : i32
    %c0_i32_0 = arith.constant 0 : i32
    %c0_i32_1 = arith.constant 0 : i32
    return %c0_i32, %c0_i32_0 : i32, i32
  }
  func.func @transform_2(%arg0: i32) -> (i32, i32) {
    %c0_i32 = arith.constant 0 : i32
    %c0_i32_0 = arith.constant 0 : i32
    return %arg0, %c0_i32 : i32, i32
  }
  func.func @transform_3(%arg0: i32) -> (i32, i32, i32) {
    %c0_i32 = arith.constant 0 : i32
    %c0_i32_0 = arith.constant 0 : i32
    %c0_i32_1 = arith.constant 0 : i32
    return %arg0, %c0_i32, %c0_i32_0 : i32, i32, i32
  }
  func.func @transform_4(%arg0: i32) -> (i32, i32) {
    %c0_i32 = arith.constant 0 : i32
    %c0_i32_0 = arith.constant 0 : i32
    return %arg0, %c0_i32 : i32, i32
  }
  func.func @transform_5(%arg0: i32) -> (i32, i32, i32) {
    %c0_i32 = arith.constant 0 : i32
    %c0_i32_0 = arith.constant 0 : i32
    %c0_i32_1 = arith.constant 0 : i32
    return %arg0, %c0_i32, %c0_i32_0 : i32, i32, i32
  }
}

</mosaic_0001>

<bundles_post_ra>
// kernel: tpu_custom_call.1
= control target key start
LH: loop header
LB: loop body
LE: loop exit
PB: predicated region body
PF: predicated region fallthrough
CT: control target
= control target key end

     0   :  { %s2650_s0 = inlined_call_operand.hbm [shape: f32[32,32], index: 0, kind: input, shape index: {}]   ;;  %s2651_s1 = inlined_call_operand.hbm [shape: f32[1,32], index: 1, kind: input, shape index: {}]   ;;  %s2652_s2 = inlined_call_operand.hbm [shape: f32[16,32], index: 2, kind: input, shape index: {}]   ;;  %s2653_s3 = inlined_call_operand.hbm [shape: f32[16,32,32], index: 3, kind: input, shape index: {}]   ;;  %s2654_s4 = inlined_call_operand.hbm [shape: f32[16,32], index: 4, kind: output, shape index: {0}]   ;;  %s2655_s5 = inlined_call_operand.hbm [shape: f32[16,32,32], index: 5, kind: output, shape index: {1}]  }
   0x1   :  { %2660 = sst [smem:[#allocation19_spill]] %s2650_s0 }
   0x2   :  { %2661 = sst [smem:[#allocation20_spill]] %s2651_s1 }
   0x3   :  { %11 = vsyncpa [#allocation3], 0 }
   0x4   :  { %12 = vsyncpa [#allocation6], 0 }
   0x5   :  { %13 = vsyncpa [#allocation4], 0 }
   0x6   :  { %15 = vsyncpa [#allocation4 + $0x1], 0 }
   0x7   :  { %16 = vsyncpa [#allocation11], 0 }
   0x8   :  { %18 = vsyncpa [#allocation11 + $0x1], 0  ;;  %s2090_s18 = smov 0   ;;  %s2092_s19 = smov 0  }
   0x9   :  { %s2094_s20 = smov 0   ;;  %s2096_s21 = smov 0  }
   0xa LB: > { %2662 = sst [smem:[#allocation17_spill]] %s2048_s20  ;;  %s2111_s22 = sadd.s32 4294967295, %s2052_s21   ;;  %s2052_s21 = sphi %s2096_s21, %s2683_s21   ;;  %s2048_s20 = sphi %s2094_s20, %s2680_s20   ;;  %s2044_s19 = sphi %s2092_s19, %s2682_s19   ;;  %s2040_s18 = sphi %s2090_s18, %s2681_s18  }
   0xb   : > { %s1627_s23 = sadd.s32 4294967294, %s2052_s21   ;;  %p86_p0 = scmp.ne.s32.totalorder %s2044_s19, %s2040_s18 }
   0xc   : > { %p2659_p1 = scmp.eq.s32.totalorder %s2111_s22, 0  ;;  %p136_p2 = scmp.eq.s32.totalorder %s2111_s22, 1 }
   0xd   : > { %p142_p3 = scmp.eq.s32.totalorder %s1627_s23, 1  ;;  %p1628_p5 = scmp.ge.s32.totalorder %s2052_s21, 1 }
   0xe   : > { %p2120_p4 = por %p2659_p1, %p86_p0  ;;  %p175_p7 = scmp.lt.s32.totalorder %s2052_s21, 3 }
   0xf   : > { %p2125_p6 = por %p142_p3, %p86_p0  ;;  %s2665_s0 = sld [smem:[#allocation19_spill]] }
  0x10   : > { %p2133_p8 = pnand %p1628_p5, %p175_p7  ;;  %s2054_s30 = smov [#allocation2]  }
  0x11   : > { %s188_s6 = sshll.u32 %s2054_s30, 4  ;;  %s2147_s8 = sadd.s32 1, %s2052_s21   ;;  %s189_s6 = int_to_ptr.vmem [resolvable:$true] %s188_s6 }
  0x12   : > { %p1758_p9 = pneg %p2133_p8  ;;  %s2656_s9 = smov 128  }
  0x13   : > { %s2657_s10 = smov 8   ;;  %s70_s11 = ssub.s32 %s2052_s21, %s2147_s8 }
  0x14   : > { %p2141_p10 = pnand %p1758_p9, %p2659_p1  ;;  %s73_s12 = sadd.s32 1, %s2048_s20 }
  0x15   : > { %s186_s28 = sshll.u32 %s2665_s0, 4  ;;  %p71_p12 = scmp.eq.s32.totalorder %s70_s11, 0  ;;  %s187_s28 = int_to_ptr.hbm [resolvable:$true] %s186_s28 }
  0x16   : > { %1761 = dma.hbm_to_vmem [thread:$0]  (!%p2141_p10), %s187_s28, 512, %s189_s6, [#allocation3], %s2656_s9, %s2656_s9, %s2657_s10  }
  0x17   : > { %p80_p13 = scmp.ne.s32.totalorder %s2048_s20, %s2044_s19  ;;  %p81_p0 = scmp.eq.s32.totalorder %s2052_s21, 0 }
  0x18   : > { %p1781_p3 = scmp.lt.s32.totalorder %s2052_s21, 2  ;;  %s214_s15 = sand.u32 1, %s2052_s21  }
  0x19   : > { %s2162_s13 = scalar_select %p71_p12, %s2048_s20, %s73_s12  }
  0x1a   : > { %p82_p5 = por %p81_p0, %p80_p13  ;;  %p2166_p7 = por %p136_p2, %p80_p13 }
  0x1b   : > { %2668 = sst [smem:[#allocation18_spill]] %s2162_s13  ;;  %s216_s16 = sand.u32 1, %s2048_s20  }
  0x1c   : > { %s1632_s17 = sshll.u32 %s216_s16, 3  ;;  %s1633_s23 = sshll.u32 %s2052_s21, 3 }
  0x1d   : > { %s222_s28 = scalar_lea.hbm %s2652_s2, %s1633_s23  ;;  %s218_s30 = scalar_lea.vmem [#allocation7], %s1632_s17 }
  0x1e   : > { %s226_s6 = sshll.u32 %s218_s30, 4  ;;  %s224_s11 = sshll.u32 %s222_s28, 4  ;;  %s227_s6 = int_to_ptr.vmem [resolvable:$true] %s226_s6  ;;  %s225_s11 = int_to_ptr.hbm [resolvable:$true] %s224_s11 }
  0x1f   : > { %p2178_p9 = pnand %p1781_p3, %p82_p5  ;;  %s1634_s9 = sshll.u32 %s216_s16, 8 }
  0x20   : > { %s2671_s1 = sld [smem:[#allocation20_spill]]  ;;  %s2185_s20 = scalar_lea.sflag [#allocation3], %s214_s15 }
  0x21   : > { %s1856_s23 = sshra.s32 %s225_s11, 4  ;;  %p1860_p12 = pneg %p2178_p9  ;;  %s1857_s23 = int_to_ptr.hbm [resolvable:$true] %s1856_s23 }
  0x22   : > { %s1858_s17 = scalar_lea.hbm %s1857_s23, 8  ;;  %s1863_s16 = scalar_lea.hbm %s2652_s2, 16 }
  0x23   : > { %p1859_p2 = scmp.ne.s32.totalorder %s1857_s23, %s1858_s17  ;;  %p1864_p3 = scmp.lt.s32.totalorder %s1857_s23, %s2652_s2 }
  0x24   : > { %p1865_p5 = scmp.lt.s32.totalorder %s1863_s16, %s1858_s17 }
  0x25   : > { %p1861_p13 = pnand %p1860_p12, %p1859_p2 }
  0x26   : > { %s201_s13 = sshll.u32 %s2671_s1, 4  ;;  %p1866_p11 = por %p1865_p5, %p1864_p3  ;;  %s202_s13 = int_to_ptr.hbm [resolvable:$true] %s201_s13 }
  0x27   : > { %p1862_p0 = pneg %p1861_p13 }
  0x29   : > { %p1867_p1 = pnand %p1866_p11, %p1862_p0 }
  0x2b   : > { %1870 = shalt.err (!%p1867_p1)
}
  0x2c   : > { %1768 = dma.hbm_to_vmem [thread:$0]  (!%p2178_p9), %s225_s11, 128, %s227_s6, %s2185_s20  }
  0x2d   : > { %s237_s0 = scalar_lea.vmem [#allocation8], %s1634_s9  ;;  %s2057_s15 = smov [#allocation5]  }
  0x2e   : > { %s246_s10 = sshll.u32 %s237_s0, 4  ;;  %s203_s26 = sshll.u32 %s2057_s15, 4  ;;  %s247_s10 = int_to_ptr.vmem [resolvable:$true] %s246_s10  ;;  %s204_s26 = int_to_ptr.vmem [resolvable:$true] %s203_s26 }
  0x2f   : > { %s1731_s27 = sshll.u32 %s2052_s21, 8  ;;  %s1923_s0 = scalar_lea.hbm %s2653_s3, 512 }
  0x30   : > { %s243_s16 = scalar_lea.hbm %s2653_s3, %s1731_s27 }
  0x31   : > { %1764 = dma.hbm_to_vmem [thread:$0]  (!%p2141_p10), %s202_s13, 16, %s204_s26, [#allocation6]  }
  0x32   : > { %s244_s28 = sshll.u32 %s243_s16, 4  ;;  %s245_s28 = int_to_ptr.hbm [resolvable:$true] %s244_s28 }
  0x33   : > { %s1916_s30 = sshra.s32 %s245_s28, 4  ;;  %s1917_s30 = int_to_ptr.hbm [resolvable:$true] %s1916_s30 }
  0x34   : > { %s1918_s6 = scalar_lea.hbm %s1917_s30, 256  ;;  %p1924_p13 = scmp.lt.s32.totalorder %s1917_s30, %s2653_s3 }
  0x35   : > { %p1919_p1 = scmp.ne.s32.totalorder %s1917_s30, %s1918_s6  ;;  %p1925_p0 = scmp.lt.s32.totalorder %s1923_s0, %s1918_s6 }
  0x37   : > { %p1921_p11 = pnand %p1919_p1, %p1860_p12  ;;  %p1926_p10 = por %p1925_p0, %p1924_p13 }
  0x39   : > { %p1922_p2 = pneg %p1921_p11 }
  0x3b   : > { %p1927_p3 = pnand %p1926_p10, %p1922_p2 }
  0x3d   : > { %1930 = shalt.err (!%p1927_p3)
}
  0x3e   : > { %s2672_s7 = smov 8   ;;  %s2673_s13 = smov 128  }
  0x3f   : > { %1771 = dma.hbm_to_vmem [thread:$0]  (!%p2178_p9), %s245_s28, 4096, %s247_s10, %s2185_s20, %s2673_s13, %s2673_s13, %s2672_s7  }
  0x40   : > { %258 = sbr.rel (%p2133_p8) target bundleno = 704 (0x2c0), region = 36  ;;  %p2674_p12 = scmp.eq.s32.totalorder (!%p2133_p8), %s2111_s22, 0 }
  0x45   : > { %2019 = dma.done.wait (%p2674_p12), [#allocation3], 512   ;;  %p2675_p5 = pmov %p2674_p12 }
  0x47   : > { %2021 = vsyncadd (%p2675_p5), [#allocation3], 4294966784  ;;  %p2676_p1 = pmov %p2675_p5 }
  0x49   : > { %2023 = dma.done.wait (%p2676_p1), [#allocation6], 16   ;;  %p2677_p11 = pmov %p2676_p1 }
  0x4a   : > { %s270_s1 = sand.u32 1, %s2111_s22   ;;  %s2234_s20 = sand.u32 1, %s2044_s19  }
  0x4b   : > { %2025 = vsyncadd (%p2677_p11), [#allocation6], 4294967280  ;;  %s1641_s29 = sshll.u32 %s2234_s20, 3  ;;  %s271_s12 = scalar_lea.sflag [#allocation3], %s270_s1 }
  0x4c   : > { %s2239_s10 = scalar_lea.vmem [#allocation7], %s1641_s29 }
  0x4d   : > { %2027 = dma.done.wait (%p2120_p4), %s271_s12, 4224  }
  0x4e   : > { %2029 = vsyncadd (%p2120_p4), %s271_s12, 4294963072  ;;  %s1642_s26 = sshll.u32 %s2234_s20, 8  ;;  %vm362_vm0 = vcmask 261120   ;;  %v327_v21 = vld [vmem:[#allocation2 + $0x18] sm:$0xff]  ;;  %v326_v22 = vld [vmem:[#allocation2 + $0x10] sm:$0xff]  ;;  %s2445_s24 = scalar_lea.vmem [#allocation9], %s1641_s29 }
  0x4f   : > { %s2248_s27 = scalar_lea.vmem [#allocation8], %s1642_s26  ;;  %1645 = vmatpush.xpose.msk.msra.mxu0 %vm362_vm0, %v327_v21  ;;  %1738 = vmatpush.xpose.msk.msra.mxu2 %vm362_vm0, %v327_v21  ;;  %v325_v26 = vld [vmem:[#allocation2 + $0x8] sm:$0xff]  ;;  %v324_v27 = vld [vmem:[#allocation2] sm:$0xff]  ;;  %s2469_s23 = scalar_lea.vmem [#allocation10], %s1642_s26 }
  0x50   : > { %v2251_v0 = vld [vmem:[%s2248_s27 + $0x80] sm:$0xff]  ;;  %v2263_v3 = vld [vmem:[%s2248_s27 + $0x88] sm:$0xff]  ;;  %v2275_v6 = vld [vmem:[%s2248_s27 + $0x90] sm:$0xff]  ;;  %1650 = vmatpush.xpose.msk.msra.mxu1 %vm362_vm0, %v327_v21  ;;  %1734 = vmatpush.xpose.msk.msra.mxu3 %vm362_vm0, %v327_v21  ;;  %s1724_s17 = sshll.u32 %s2111_s22, 3  ;;  %s1464_s6 = sshll.u32 %s2445_s24, 4  ;;  %s1465_s6 = int_to_ptr.vmem [resolvable:$true] %s1464_s6 }
  0x51   : > { %v2254_v1 = vld [vmem:[%s2248_s27 + $0x60] sm:$0xff]  ;;  %736 = vxpose.xlu1.b32.start [1/4] (short) (narrow) %v2251_v0, 32  ;;  %v2266_v4 = vld [vmem:[%s2248_s27 + $0x68] sm:$0xff]  ;;  %v2278_v7 = vld [vmem:[%s2248_s27 + $0x70] sm:$0xff]  ;;  %s1462_s30 = scalar_lea.hbm %s2654_s4, %s1724_s17  ;;  %s1447_s11 = scalar_lea.sflag [#allocation4], %s2234_s20 }
  0x52   : > { %704 = vxpose.xlu0.b32.start [1/4] (short) (narrow) %v2254_v1, 32  ;;  %v2259_v2 = vld [vmem:[%s2248_s27] sm:$0xff]  ;;  %v2269_v5 = vld [vmem:[%s2248_s27 + $0x8] sm:$0xff]  ;;  %v2281_v8 = vld [vmem:[%s2248_s27 + $0x10] sm:$0xff]  ;;  %s1466_s9 = sshll.u32 %s1462_s30, 4  ;;  %s1966_s1 = scalar_lea.hbm %s2654_s4, 16  ;;  %s1467_s9 = int_to_ptr.hbm [resolvable:$true] %s1466_s9 }
  0x53   : > { %608 = vxpose.xlu2.b32.start [1/4] (short) (narrow) %v2259_v2, 32  ;;  %v2287_v9 = vld [vmem:[%s2248_s27 + $0x98] sm:$0xff]  ;;  %v2299_v12 = vld [vmem:[%s2248_s27 + $0xa0] sm:$0xff]  ;;  %v2307_v14 = vld [vmem:[%s2248_s27 + $0xa8] sm:$0xff]  ;;  %1646 = vmatpush.xpose.msk.msra.mxu0 %vm362_vm0, %v326_v22  ;;  %s1960_s0 = sshra.s32 %s1467_s9, 4  ;;  %s1961_s0 = int_to_ptr.hbm [resolvable:$true] %s1960_s0 }
  0x54   : > { %v2290_v10 = vld [vmem:[%s2248_s27 + $0x78] sm:$0xff]  ;;  %v2302_v13 = vld [vmem:[%s2248_s27 + $0x20] sm:$0xff]  ;;  %v2310_v15 = vld [vmem:[%s2248_s27 + $0x28] sm:$0xff]  ;;  %1739 = vmatpush.xpose.msk.msra.mxu2 %vm362_vm0, %v326_v22  ;;  %1651 = vmatpush.xpose.msk.msra.mxu1 %vm362_vm0, %v326_v22  ;;  %s1962_s15 = scalar_lea.hbm %s1961_s0, 8  ;;  %p1967_p2 = scmp.lt.s32.totalorder %s1961_s0, %s2654_s4 }
  0x55   : > { %v2293_v11 = vld [vmem:[%s2248_s27 + $0x18] sm:$0xff]  ;;  %v2315_v16 = vld [vmem:[%s2248_s27 + $0xb0] sm:$0xff]  ;;  %v2331_v20 = vld [vmem:[%s2248_s27 + $0xc0] sm:$0xff]  ;;  %1735 = vmatpush.xpose.msk.msra.mxu3 %vm362_vm0, %v326_v22  ;;  %p1963_p4 = scmp.ne.s32.totalorder %s1961_s0, %s1962_s15  ;;  %p1968_p13 = scmp.lt.s32.totalorder %s1966_s1, %s1962_s15 }
  0x56   : > { %v2318_v17 = vld [vmem:[%s2248_s27 + $0x30] sm:$0xff]  ;;  %v2323_v18 = vld [vmem:[%s2248_s27 + $0xb8] sm:$0xff]  ;;  %v338_v23 = vld [vmem:[%s2248_s27 + $0x40] sm:$0xff] }
  0x57   : > { %v2326_v19 = vld [vmem:[%s2248_s27 + $0x38] sm:$0xff]  ;;  %v2340_v24 = vld [vmem:[%s2248_s27 + $0xe0] sm:$0xff]  ;;  %v355_v25 = vld [vmem:[%s2248_s27 + $0xc8] sm:$0xff]  ;;  %1647 = vmatpush.xpose.msk.msra.mxu0 %vm362_vm0, %v325_v26  ;;  %p1964_p8 = pnand %p1963_p4, %p2166_p7  ;;  %p1969_p0 = por %p1968_p13, %p1967_p2 }
  0x58   : > { %1740 = vmatpush.xpose.msk.msra.mxu2 %vm362_vm0, %v325_v26  ;;  %v339_v28 = vld [vmem:[%s2248_s27 + $0x48] sm:$0xff]  ;;  %1652 = vmatpush.xpose.msk.msra.mxu1 %vm362_vm0, %v325_v26  ;;  %v356_v30 = vld [vmem:[%s2248_s27 + $0xd0] sm:$0xff]  ;;  %v357_v34 = vld [vmem:[%s2248_s27 + $0xd8] sm:$0xff] }
  0x59   : > { %737 = vxpose.xlu1.b32.cont [2/4] (short) (narrow) %v2263_v3, 32  ;;  %v359_v29 = vld [vmem:[%s2248_s27 + $0xe8] sm:$0xff]  ;;  %1736 = vmatpush.xpose.msk.msra.mxu3 %vm362_vm0, %v325_v26  ;;  %v329_v31 = vld [vmem:[%s2239_s10] sm:$0xff]  ;;  %p1965_p9 = pneg %p1964_p8 }
  0x5a   : > { %705 = vxpose.xlu0.b32.cont [2/4] (short) (narrow) %v2266_v4, 32  ;;  %v340_v32 = vld [vmem:[%s2248_s27 + $0x50] sm:$0xff]  ;;  %v341_v35 = vld [vmem:[%s2248_s27 + $0x58] sm:$0xff] }
  0x5b   : > { %609 = vxpose.xlu2.b32.cont [2/4] (short) (narrow) %v2269_v5, 32  ;;  %1648 = vmatpush.xpose.msk.msra.mxu0 %vm362_vm0, %v324_v27  ;;  %v360_v33 = vld [vmem:[%s2248_s27 + $0xf0] sm:$0xff]  ;;  %v361_v36 = vld [vmem:[%s2248_s27 + $0xf8] sm:$0xff]  ;;  %p1970_p10 = pnand %p1969_p0, %p1965_p9 }
  0x5c   : > { %1741 = vmatpush.xpose.msk.msra.mxu2 %vm362_vm0, %v324_v27  ;;  %1653 = vmatpush.xpose.msk.msra.mxu1 %vm362_vm0, %v324_v27 }
  0x5d   : > { %1737 = vmatpush.xpose.msk.msra.mxu3 %vm362_vm0, %v324_v27 }
  0x5e   : > { %1649 = vmatmul.msk.f32.vlgmr.msra.gmra.mxu0 %vm362_vm0, %v329_v31 }
  0x5f   : > { %1686 = vmatpush.xpose.msk.msrb.mxu0 %vm362_vm0, %v327_v21  ;;  %1654 = vmatmul.msk.f32.vlgmr.msra.gmra.mxu1 %vm362_vm0, %v2259_v2 }
  0x60   : > { %1671 = vmatmul.msk.f32.vlgmr.msra.gmra.mxu3 %vm362_vm0, %v2263_v3 }
  0x61   : > { %738 = vxpose.xlu1.b32.cont [3/4] (short) (narrow) %v2275_v6, 32 }
  0x62   : > { %706 = vxpose.xlu0.b32.cont [3/4] (short) (narrow) %v2278_v7, 32 }
  0x63   : > { %610 = vxpose.xlu2.b32.cont [3/4] (short) (narrow) %v2281_v8, 32  ;;  %1687 = vmatpush.xpose.msk.msrb.mxu0 %vm362_vm0, %v326_v22 }
  0x67   : > { %1688 = vmatpush.xpose.msk.msrb.mxu0 %vm362_vm0, %v325_v26  ;;  %1655 = vmatmul.msk.f32.gmra.mxu1 %vm362_vm0, %v2269_v5 }
  0x68   : > { %1672 = vmatmul.msk.f32.gmra.mxu3 %vm362_vm0, %v2275_v6 }
  0x69   : > { %739 = vxpose.xlu1.b32.end [4/4] (short) (narrow) %v2287_v9, 32 }
  0x6a   : > { %707 = vxpose.xlu0.b32.end [4/4] (short) (narrow) %v2290_v10, 32 }
  0x6b   : > { %611 = vxpose.xlu2.b32.end [4/4] (short) (narrow) %v2293_v11, 32  ;;  %1689 = vmatpush.xpose.msk.msrb.mxu0 %vm362_vm0, %v324_v27 }
  0x6f   : > { %1656 = vmatmul.msk.f32.gmra.mxu1 %vm362_vm0, %v2281_v8 }
  0x70   : > { %1673 = vmatmul.msk.f32.gmra.mxu3 %vm362_vm0, %v2287_v9 }
  0x71   : > { %640 = vxpose.xlu1.b32.start [1/4] (short) (narrow) %v2302_v13, 32 }
  0x72   : > { %768 = vxpose.xlu0.b32.start [1/4] (short) (narrow) %v2299_v12, 32 }
  0x73   : > { %800 = vxpose.xlu2.b32.start [1/4] (short) (narrow) %v2331_v20, 32 }
  0x77   : > { %1657 = vmatmul.msk.f32.gmra.mxu1 %vm362_vm0, %v2293_v11 }
  0x78   : > { %1674 = vmatmul.msk.f32.gmra.mxu3 %vm362_vm0, %v2299_v12 }
  0x79   : > { %641 = vxpose.xlu1.b32.cont [2/4] (short) (narrow) %v2310_v15, 32 }
  0x7a   : > { %769 = vxpose.xlu0.b32.cont [2/4] (short) (narrow) %v2307_v14, 32 }
  0x7b   : > { %801 = vxpose.xlu2.b32.cont [2/4] (short) (narrow) %v355_v25, 32 }
  0x7f   : > { %1658 = vmatmul.msk.f32.gmra.mxu1 %vm362_vm0, %v2302_v13 }
  0x80   : > { %1675 = vmatmul.msk.f32.gmra.mxu3 %vm362_vm0, %v2307_v14 }
  0x81   : > { %642 = vxpose.xlu1.b32.cont [3/4] (short) (narrow) %v2318_v17, 32 }
  0x82   : > { %770 = vxpose.xlu0.b32.cont [3/4] (short) (narrow) %v2315_v16, 32 }
  0x83   : > { %802 = vxpose.xlu2.b32.cont [3/4] (short) (narrow) %v356_v30, 32 }
  0x87   : > { %1659 = vmatmul.msk.f32.gmra.mxu1 %vm362_vm0, %v2310_v15 }
  0x88   : > { %1676 = vmatmul.msk.f32.gmra.mxu3 %vm362_vm0, %v2315_v16 }
  0x89   : > { %643 = vxpose.xlu1.b32.end [4/4] (short) (narrow) %v2326_v19, 32 }
  0x8a   : > { %771 = vxpose.xlu0.b32.end [4/4] (short) (narrow) %v2323_v18, 32 }
  0x8b   : > { %803 = vxpose.xlu2.b32.end [4/4] (short) (narrow) %v357_v34, 32 }
  0x8f   : > { %1660 = vmatmul.msk.f32.gmra.mxu1 %vm362_vm0, %v2318_v17 }
  0x90   : > { %1677 = vmatmul.msk.f32.gmra.mxu3 %vm362_vm0, %v2323_v18 }
  0x91   : > { %832 = vxpose.xlu1.b32.start [1/4] (short) (narrow) %v2340_v24, 32 }
  0x92   : > { %672 = vxpose.xlu0.b32.start [1/4] (short) (narrow) %v338_v23, 32 }
  0x97   : > { %1661 = vmatmul.msk.f32.gmra.mxu1 %vm362_vm0, %v2326_v19 }
  0x98   : > { %1678 = vmatmul.msk.f32.gmra.mxu3 %vm362_vm0, %v2331_v20 }
  0x99   : > { %833 = vxpose.xlu1.b32.cont [2/4] (short) (narrow) %v359_v29, 32 }
  0x9a   : > { %673 = vxpose.xlu0.b32.cont [2/4] (short) (narrow) %v339_v28, 32 }
  0x9f   : > { %1662 = vmatmul.msk.f32.gmra.mxu1 %vm362_vm0, %v338_v23 }
  0xa0   : > { %1679 = vmatmul.msk.f32.gmra.mxu3 %vm362_vm0, %v355_v25 }
  0xa1   : > { %834 = vxpose.xlu1.b32.cont [3/4] (short) (narrow) %v360_v33, 32 }
  0xa2   : > { %674 = vxpose.xlu0.b32.cont [3/4] (short) (narrow) %v340_v32, 32 }
  0xa7   : > { %1663 = vmatmul.msk.f32.gmra.mxu1 %vm362_vm0, %v339_v28 }
  0xa8   : > { %1680 = vmatmul.msk.f32.gmra.mxu3 %vm362_vm0, %v356_v30 }
  0xa9   : > { %835 = vxpose.xlu1.b32.end [4/4] (short) (narrow) %v361_v36, 32 }
  0xaa   : > { %675 = vxpose.xlu0.b32.end [4/4] (short) (narrow) %v341_v35, 32 }
  0xaf   : > { %1664 = vmatmul.msk.f32.gmra.mxu1 %vm362_vm0, %v340_v32 }
  0xb0   : > { %1681 = vmatmul.msk.f32.gmra.mxu3 %vm362_vm0, %v357_v34 }
  0xb7   : > { %1665 = vmatmul.msk.f32.gmra.mxu1 %vm362_vm0, %v341_v35 }
  0xb8   : > { %1682 = vmatmul.msk.f32.gmra.mxu3 %vm362_vm0, %v2340_v24 }
  0xbf   : > { %1666 = vmatmul.msk.f32.gmra.mxu1 %vm362_vm0, %v2254_v1 }
  0xc0   : > { %1683 = vmatmul.msk.f32.gmra.mxu3 %vm362_vm0, %v359_v29 }
  0xc7   : > { %1667 = vmatmul.msk.f32.gmra.mxu1 %vm362_vm0, %v2266_v4 }
  0xc8   : > { %1684 = vmatmul.msk.f32.gmra.mxu3 %vm362_vm0, %v360_v33 }
  0xcf   : > { %1668 = vmatmul.msk.f32.gmra.mxu1 %vm362_vm0, %v2278_v7 }
  0xd0   : > { %1685 = vmatmul.msk.f32.gmra.mxu3 %vm362_vm0, %v361_v36 }
  0xd7   : > { %1669 = vmatmul.msk.f32.gmra.mxu1 %vm362_vm0, %v2290_v10 }
  0xdb   : > { %v395_v60 = vpop.f32.mrf.mxu0 }
  0xdc   : > { %398 = vst.msk [vmem:[%s2445_s24] sm:$0xff] %vm362_vm0, %v395_v60  ;;  %v512_v30 = vpop.f32.mrf.mxu1 }
  0xdf   : > { %1670 = vmatmul.msk.f32.gmra.mxu1 %vm362_vm0, %v2251_v0 }
  0xe4   : > { %v515_v33 = vpop.f32.mrf.mxu1 }
  0xec   : > { %v624_v37 = vpop.trf.xlu2  ;;  %v518_v35 = vpop.f32.mrf.mxu1 }
  0xed   : > { %1690 = vmatmul.msk.f32.vlgmr.msrb.gmra.mxu0 %vm362_vm0, %v624_v37 }
  0xf4   : > { %v625_v38 = vpop.trf.xlu2  ;;  %v521_v37 = vpop.f32.mrf.mxu1 }
  0xf5   : > { %1691 = vmatmul.msk.f32.gmra.mxu0 %vm362_vm0, %v625_v38  ;;  %v752_v39 = vpop.trf.xlu1  ;;  %v328_v38 = vld [vmem:[#allocation5] sm:$0x1] }
  0xf6   : > { %v720_v40 = vpop.trf.xlu0 }
  0xfc   : > { %v626_v41 = vpop.trf.xlu2 }
  0xfd   : > { %1692 = vmatmul.msk.f32.gmra.mxu0 %vm362_vm0, %v626_v41  ;;  %v753_v42 = vpop.trf.xlu1 }
  0xfe   : > { %v721_v43 = vpop.trf.xlu0 }
 0x104   : > { %v627_v44 = vpop.trf.xlu2 }
 0x105   : > { %1693 = vmatmul.msk.f32.gmra.mxu0 %vm362_vm0, %v627_v44  ;;  %v754_v45 = vpop.trf.xlu1 }
 0x106   : > { %v722_v46 = vpop.trf.xlu0 }
 0x10c   : > { %v816_v62 = vpop.trf.xlu2 }
 0x10d   : > { %v755_v47 = vpop.trf.xlu1 }
 0x10e   : > { %v723_v48 = vpop.trf.xlu0 }
 0x10f   : > { %1705 = vmatmul.msk.f32.vlgmr.msra.gmra.mxu2 %vm362_vm0, %v723_v48 }
 0x114   : > { %v817_v63 = vpop.trf.xlu2 }
 0x115   : > { %v656_v50 = vpop.trf.xlu1 }
 0x116   : > { %v784_v49 = vpop.trf.xlu0  ;;  %1694 = vmatmul.msk.f32.gmra.mxu0 %vm362_vm0, %v656_v50 }
 0x117   : > { %1706 = vmatmul.msk.f32.gmra.mxu2 %vm362_vm0, %v752_v39  ;;  %v1329_v39 = vmul.f32 1.442695, %v328_v38 }
 0x119   : > { %1824 = vpow2.f32 %v1329_v39 }
 0x11c   : > { %v818_v0 = vpop.trf.xlu2 }
 0x11d   : > { %v657_v52 = vpop.trf.xlu1 }
 0x11e   : > { %v785_v51 = vpop.trf.xlu0  ;;  %1695 = vmatmul.msk.f32.gmra.mxu0 %vm362_vm0, %v657_v52 }
 0x11f   : > { %1707 = vmatmul.msk.f32.gmra.mxu2 %vm362_vm0, %v753_v42  ;;  %v524_v42 = vpop.f32.mrf.mxu1 }
 0x124   : > { %v819_v2 = vpop.trf.xlu2 }
 0x125   : > { %v658_v54 = vpop.trf.xlu1 }
 0x126   : > { %v786_v53 = vpop.trf.xlu0  ;;  %1696 = vmatmul.msk.f32.gmra.mxu0 %vm362_vm0, %v658_v54 }
 0x127   : > { %1708 = vmatmul.msk.f32.gmra.mxu2 %vm362_vm0, %v754_v45  ;;  %v1825_v45 = vpop.eup %1824 }
 0x12d   : > { %v659_v56 = vpop.trf.xlu1 }
 0x12e   : > { %v787_v55 = vpop.trf.xlu0  ;;  %1697 = vmatmul.msk.f32.gmra.mxu0 %vm362_vm0, %v659_v56 }
 0x12f   : > { %1709 = vmatmul.msk.f32.gmra.mxu2 %vm362_vm0, %v755_v47 }
 0x135   : > { %v848_v3 = vpop.trf.xlu1 }
 0x136   : > { %v688_v57 = vpop.trf.xlu0 }
 0x137   : > { %1698 = vmatmul.msk.f32.gmra.mxu0 %vm362_vm0, %v688_v57  ;;  %1710 = vmatmul.msk.f32.gmra.mxu2 %vm362_vm0, %v784_v49 }
 0x13d   : > { %v849_v5 = vpop.trf.xlu1 }
 0x13e   : > { %v689_v58 = vpop.trf.xlu0 }
 0x13f   : > { %1699 = vmatmul.msk.f32.gmra.mxu0 %vm362_vm0, %v689_v58  ;;  %1711 = vmatmul.msk.f32.gmra.mxu2 %vm362_vm0, %v785_v51  ;;  %v2464_v51 = vpop.f32.mrf.mxu1 }
 0x145   : > { %v850_v7 = vpop.trf.xlu1 }
 0x146   : > { %v690_v59 = vpop.trf.xlu0 }
 0x147   : > { %1700 = vmatmul.msk.f32.gmra.mxu0 %vm362_vm0, %v690_v59  ;;  %1712 = vmatmul.msk.f32.gmra.mxu2 %vm362_vm0, %v786_v53 }
 0x14d   : > { %v851_v9 = vpop.trf.xlu1 }
 0x14e   : > { %v691_v61 = vpop.trf.xlu0 }
 0x14f   : > { %1701 = vmatmul.msk.f32.gmra.mxu0 %vm362_vm0, %v691_v61  ;;  %1713 = vmatmul.msk.f32.gmra.mxu2 %vm362_vm0, %v787_v55  ;;  %v2473_v55 = vpop.f32.mrf.mxu1 }
 0x157   : > { %1702 = vmatmul.msk.f32.gmra.mxu0 %vm362_vm0, %v720_v40  ;;  %1714 = vmatmul.msk.f32.gmra.mxu2 %vm362_vm0, %v816_v62  ;;  %v1332_v40 = vlaneseq  ;;  %v2475_v57 = vpop.f32.mrf.mxu1 }
 0x159   : > { %v1338_v44 = vand.u32 127, %v1332_v40 }
 0x15f   : > { %1703 = vmatmul.msk.f32.gmra.mxu0 %vm362_vm0, %v721_v43  ;;  %1715 = vmatmul.msk.f32.gmra.mxu2 %vm362_vm0, %v817_v63  ;;  %v1333_v43 = vshrl.u32 %v1332_v40, 7  ;;  %v2477_v58 = vpop.f32.mrf.mxu1 }
 0x161   : > { %vm1339_vm1 = vcmp.eq.s32.totalorder %v1333_v43, %v1338_v44  ;;  %v1334_v59 = vadd.s32 8, %v1333_v43 }
 0x163   : > { %vm1340_vm2 = vcmp.eq.s32.totalorder %v1334_v59, %v1338_v44 }
 0x167   : > { %1704 = vmatmul.msk.f32.gmra.mxu0 %vm362_vm0, %v722_v46  ;;  %1716 = vmatmul.msk.f32.gmra.mxu2 %vm362_vm0, %v818_v0  ;;  %v1331_v46 = vmax.f32 %v1825_v45, 0.0001  ;;  %v2484_v0 = vpop.f32.mrf.mxu1 }
 0x169   : > { %v1344_v47 = vperm.slane %v1331_v46, 0 }
 0x16a   : > { %v977_v1 = vpop.f32.mrf.mxu0 }
 0x16b   : > { %1073 = vxpose.xlu2.b32.start [1/4] (short) (narrow) %v977_v1, 32  ;;  %v2462_v49 = vsel %vm1339_vm1, %v1344_v47, 0.0  ;;  %v2479_v62 = vsel %vm1340_vm2, %v1344_v47, 0.0  ;;  %v1335_v1 = vadd.s32 16, %v1333_v43 }
 0x16d   : > { %vm1341_vm3 = vcmp.eq.s32.totalorder %v1335_v1, %v1338_v44 }
 0x16f   : > { %1717 = vmatmul.msk.f32.gmra.mxu2 %vm362_vm0, %v819_v2 }
 0x172   : > { %v980_v4 = vpop.f32.mrf.mxu0 }
 0x173   : > { %1074 = vxpose.xlu2.b32.cont [2/4] (short) (narrow) %v980_v4, 32  ;;  %v2486_v4 = vpop.f32.mrf.mxu3 }
 0x177   : > { %1718 = vmatmul.msk.f32.gmra.mxu2 %vm362_vm0, %v848_v3 }
 0x17a   : > { %v983_v6 = vpop.f32.mrf.mxu0 }
 0x17b   : > { %1075 = vxpose.xlu2.b32.cont [3/4] (short) (narrow) %v983_v6, 32 }
 0x17f   : > { %1719 = vmatmul.msk.f32.gmra.mxu2 %vm362_vm0, %v849_v5  ;;  %v2488_v5 = vsel %vm1341_vm3, %v1344_v47, 0.0 }
 0x182   : > { %v986_v8 = vpop.f32.mrf.mxu0 }
 0x183   : > { %1076 = vxpose.xlu2.b32.end [4/4] (short) (narrow) %v986_v8, 32  ;;  %v1336_v8 = vadd.s32 24, %v1333_v43 }
 0x185   : > { %vm1342_vm4 = vcmp.eq.s32.totalorder %v1336_v8, %v1338_v44 }
 0x187   : > { %1720 = vmatmul.msk.f32.gmra.mxu2 %vm362_vm0, %v850_v7  ;;  %v2493_v7 = vpop.f32.mrf.mxu1 }
 0x18f   : > { %1721 = vmatmul.msk.f32.gmra.mxu2 %vm362_vm0, %v851_v9 }
 0x192   : > { %v1022_v10 = vpop.f32.mrf.mxu2 }
 0x193   : > { %v989_v11 = vpop.f32.mrf.mxu0 }
 0x194   : > { %1105 = vxpose.xlu0.b32.start [1/4] (short) (narrow) %v989_v11, 32  ;;  %v2495_v11 = vsel %vm1342_vm4, %v1344_v47, 0.0 }
 0x19a   : > { %v1025_v12 = vpop.f32.mrf.mxu2 }
 0x19b   : > { %v992_v13 = vpop.f32.mrf.mxu0 }
 0x19c   : > { %1106 = vxpose.xlu0.b32.cont [2/4] (short) (narrow) %v992_v13, 32  ;;  %v2498_v13 = vpop.f32.mrf.mxu3 }
 0x1a2   : > { %v1028_v14 = vpop.f32.mrf.mxu2 }
 0x1a3   : > { %v995_v15 = vpop.f32.mrf.mxu0 }
 0x1a4   : > { %1107 = vxpose.xlu0.b32.cont [3/4] (short) (narrow) %v995_v15, 32 }
 0x1aa   : > { %v1031_v16 = vpop.f32.mrf.mxu2 }
 0x1ab   : > { %v998_v17 = vpop.f32.mrf.mxu0 }
 0x1ac   : > { %1108 = vxpose.xlu0.b32.end [4/4] (short) (narrow) %v998_v17, 32 }
 0x1b2   : > { %v1034_v18 = vpop.f32.mrf.mxu2 }
 0x1b4   : > { %v1001_v19 = vpop.f32.mrf.mxu0  ;;  %1201 = vxpose.xlu0.b32.start [1/4] (short) (narrow) %v1025_v12, 32 }
 0x1b5   : > { %1137 = vxpose.xlu1.b32.start [1/4] (short) (narrow) %v1001_v19, 32 }
 0x1ba   : > { %v1037_v20 = vpop.f32.mrf.mxu2 }
 0x1bc   : > { %v1004_v21 = vpop.f32.mrf.mxu0  ;;  %1202 = vxpose.xlu0.b32.cont [2/4] (short) (narrow) %v1028_v14, 32  ;;  %v2502_v14 = vpop.f32.mrf.mxu1 }
 0x1bd   : > { %1138 = vxpose.xlu1.b32.cont [2/4] (short) (narrow) %v1004_v21, 32 }
 0x1c2   : > { %v1040_v22 = vpop.f32.mrf.mxu2 }
 0x1c4   : > { %v1007_v23 = vpop.f32.mrf.mxu0  ;;  %1203 = vxpose.xlu0.b32.cont [3/4] (short) (narrow) %v1031_v16, 32  ;;  %v548_v19 = vpop.f32.mrf.mxu1 }
 0x1c5   : > { %1139 = vxpose.xlu1.b32.cont [3/4] (short) (narrow) %v1007_v23, 32 }
 0x1ca   : > { %v1043_v24 = vpop.f32.mrf.mxu2 }
 0x1cc   : > { %v1010_v25 = vpop.f32.mrf.mxu0  ;;  %1204 = vxpose.xlu0.b32.end [4/4] (short) (narrow) %v1034_v18, 32  ;;  %v2510_v18 = vpop.f32.mrf.mxu3 }
 0x1cd   : > { %1140 = vxpose.xlu1.b32.end [4/4] (short) (narrow) %v1010_v25, 32 }
 0x1d2   : > { %v1046_v26 = vpop.f32.mrf.mxu2 }
 0x1d4   : > { %v1013_v27 = vpop.f32.mrf.mxu0 }
 0x1d5   : > { %1233 = vxpose.xlu1.b32.start [1/4] (short) (narrow) %v1037_v20, 32  ;;  %1169 = vxpose.xlu2.b32.start [1/4] (short) (narrow) %v1013_v27, 32 }
 0x1da   : > { %v1049_v28 = vpop.f32.mrf.mxu2 }
 0x1dc   : > { %v1016_v29 = vpop.f32.mrf.mxu0 }
 0x1dd   : > { %1234 = vxpose.xlu1.b32.cont [2/4] (short) (narrow) %v1040_v22, 32  ;;  %1170 = vxpose.xlu2.b32.cont [2/4] (short) (narrow) %v1016_v29, 32 }
 0x1e2   : > { %v1052_v31 = vpop.f32.mrf.mxu2 }
 0x1e4   : > { %v1019_v32 = vpop.f32.mrf.mxu0 }
 0x1e5   : > { %1235 = vxpose.xlu1.b32.cont [3/4] (short) (narrow) %v1043_v24, 32  ;;  %1171 = vxpose.xlu2.b32.cont [3/4] (short) (narrow) %v1019_v32, 32 }
 0x1ea   : > { %v1055_v34 = vpop.f32.mrf.mxu2 }
 0x1ed   : > { %1236 = vxpose.xlu1.b32.end [4/4] (short) (narrow) %v1046_v26, 32  ;;  %1172 = vxpose.xlu2.b32.end [4/4] (short) (narrow) %v1022_v10, 32 }
 0x1f2   : > { %v1058_v36 = vpop.f32.mrf.mxu2 }
 0x1f5   : > { %1265 = vxpose.xlu2.b32.start [1/4] (short) (narrow) %v1049_v28, 32 }
 0x1fa   : > { %v1061_v41 = vpop.f32.mrf.mxu2 }
 0x1fb   : > { %1297 = vxpose.xlu0.b32.start [1/4] (short) (narrow) %v1061_v41, 32 }
 0x1fd   : > { %1266 = vxpose.xlu2.b32.cont [2/4] (short) (narrow) %v1052_v31, 32 }
 0x202   : > { %v1064_v48 = vpop.f32.mrf.mxu2 }
 0x203   : > { %1298 = vxpose.xlu0.b32.cont [2/4] (short) (narrow) %v1064_v48, 32 }
 0x204   : > { %v1089_v50 = vpop.trf.xlu2 }
 0x205   : > { %1267 = vxpose.xlu2.b32.cont [3/4] (short) (narrow) %v1055_v34, 32  ;;  %v1350_v52 = vadd.f32 %v1089_v50, %v512_v30 }
 0x207   : > { %v1382_v53 = vadd.f32 %v1350_v52, %v2462_v49 }
 0x209   : > { %1414 = vst.msk [vmem:[%s2469_s23] sm:$0xff] %vm362_vm0, %v1382_v53 }
 0x20a   : > { %v1067_v54 = vpop.f32.mrf.mxu2 }
 0x20b   : > { %1299 = vxpose.xlu0.b32.cont [3/4] (short) (narrow) %v1067_v54, 32 }
 0x20c   : > { %v1090_v60 = vpop.trf.xlu2 }
 0x20d   : > { %1268 = vxpose.xlu2.b32.end [4/4] (short) (narrow) %v1058_v36, 32  ;;  %v1351_v61 = vadd.f32 %v1090_v60, %v515_v33 }
 0x20f   : > { %v1383_v63 = vadd.f32 %v1351_v61, %v2479_v62 }
 0x211   : > { %1415 = vst.msk [vmem:[%s2469_s23 + $0x8] sm:$0xff] %vm362_vm0, %v1383_v63 }
 0x212   : > { %v1070_v56 = vpop.f32.mrf.mxu2 }
 0x213   : > { %1300 = vxpose.xlu0.b32.end [4/4] (short) (narrow) %v1070_v56, 32 }
 0x214   : > { %v1091_v2 = vpop.trf.xlu2 }
 0x215   : > { %v1352_v3 = vadd.f32 %v1091_v2, %v518_v35 }
 0x217   : > { %v1384_v6 = vadd.f32 %v1352_v3, %v2488_v5 }
 0x219   : > { %1416 = vst.msk [vmem:[%s2469_s23 + $0x10] sm:$0xff] %vm362_vm0, %v1384_v6 }
 0x21c   : > { %v1092_v9 = vpop.trf.xlu2 }
 0x21d   : > { %v1353_v10 = vadd.f32 %v1092_v9, %v521_v37 }
 0x21f   : > { %v1385_v12 = vadd.f32 %v1353_v10, %v2495_v11 }
 0x221   : > { %1417 = vst.msk [vmem:[%s2469_s23 + $0x18] sm:$0xff] %vm362_vm0, %v1385_v12 }
 0x238   : > { %v1121_v15 = vpop.trf.xlu0 }
 0x239   : > { %v1354_v16 = vadd.f32 %v1121_v15, %v524_v42 }
 0x23b   : > { %v1386_v17 = vadd.f32 %v1354_v16, %v2462_v49 }
 0x23d   : > { %1418 = vst.msk [vmem:[%s2469_s23 + $0x20] sm:$0xff] %vm362_vm0, %v1386_v17 }
 0x23e   : > { %1973 = shalt.err (!%p1970_p10)
}
 0x23f   : > { %1754 = dma.vmem_to_hbm [thread:$0]  (%p2166_p7), %s1465_s6, 128, %s1467_s9, %s1447_s11   ;;  %v572_v23 = vpop.f32.mrf.mxu3  ;;  %v551_v24 = vpop.f32.mrf.mxu1 }
 0x240   : > { %v1122_v20 = vpop.trf.xlu0  ;;  %s1733_s10 = sshll.u32 %s2111_s22, 8  ;;  %s1479_s17 = sshll.u32 %s2469_s23, 4  ;;  %s1480_s17 = int_to_ptr.vmem [resolvable:$true] %s1479_s17 }
 0x241   : > { %v1355_v21 = vadd.f32 %v1122_v20, %v2464_v51  ;;  %s1478_s24 = scalar_lea.hbm %s2655_s5, %s1733_s10  ;;  %s1452_s22 = scalar_lea.sflag [#allocation11], %s2234_s20 }
 0x242   : > { %s1481_s16 = sshll.u32 %s1478_s24, 4  ;;  %s1994_s11 = scalar_lea.hbm %s2655_s5, 512  ;;  %s1482_s16 = int_to_ptr.hbm [resolvable:$true] %s1481_s16 }
 0x243   : > { %v1387_v22 = vadd.f32 %v1355_v21, %v2479_v62  ;;  %s1988_s28 = sshra.s32 %s1482_s16, 4  ;;  %s1989_s28 = int_to_ptr.hbm [resolvable:$true] %s1988_s28 }
 0x244   : > { %s1990_s30 = scalar_lea.hbm %s1989_s28, 256  ;;  %p1995_p1 = scmp.lt.s32.totalorder %s1989_s28, %s2655_s5 }
 0x245   : > { %1419 = vst.msk [vmem:[%s2469_s23 + $0x28] sm:$0xff] %vm362_vm0, %v1387_v22  ;;  %p1991_p3 = scmp.ne.s32.totalorder %s1989_s28, %s1990_s30  ;;  %p1996_p11 = scmp.lt.s32.totalorder %s1994_s11, %s1990_s30 }
 0x247   : > { %v554_v28 = vpop.f32.mrf.mxu1  ;;  %v575_v30 = vpop.f32.mrf.mxu3  ;;  %p1992_p12 = pnand %p1991_p3, %p2166_p7  ;;  %p1997_p4 = por %p1996_p11, %p1995_p1 }
 0x248   : > { %v1123_v25 = vpop.trf.xlu0 }
 0x249   : > { %v1356_v26 = vadd.f32 %v1123_v25, %v2473_v55  ;;  %p1993_p5 = pneg %p1992_p12 }
 0x24b   : > { %v1388_v27 = vadd.f32 %v1356_v26, %v2488_v5  ;;  %p1998_p8 = pnand %p1997_p4, %p1993_p5 }
 0x24d   : > { %1420 = vst.msk [vmem:[%s2469_s23 + $0x30] sm:$0xff] %vm362_vm0, %v1388_v27 }
 0x24f   : > { %v557_v33 = vpop.f32.mrf.mxu1  ;;  %v578_v37 = vpop.f32.mrf.mxu3 }
 0x250   : > { %v1124_v29 = vpop.trf.xlu0 }
 0x251   : > { %v1357_v31 = vadd.f32 %v1124_v29, %v2475_v57 }
 0x253   : > { %v1389_v32 = vadd.f32 %v1357_v31, %v2495_v11 }
 0x255   : > { %1421 = vst.msk [vmem:[%s2469_s23 + $0x38] sm:$0xff] %vm362_vm0, %v1389_v32 }
 0x257   : > { %v560_v39 = vpop.f32.mrf.mxu1  ;;  %v581_v48 = vpop.f32.mrf.mxu3 }
 0x258   : > { %v1217_v34 = vpop.trf.xlu0 }
 0x259   : > { %v1153_v35 = vpop.trf.xlu1  ;;  %v1366_v40 = vadd.f32 %v1217_v34, %v560_v39 }
 0x25a   : > { %v1358_v36 = vadd.f32 %v1153_v35, %v2477_v58 }
 0x25b   : > { %v1398_v45 = vadd.f32 %v1366_v40, %v2462_v49 }
 0x25c   : > { %v1390_v38 = vadd.f32 %v1358_v36, %v2462_v49 }
 0x25d   : > { %1430 = vst.msk [vmem:[%s2469_s23 + $0x80] sm:$0xff] %vm362_vm0, %v1398_v45 }
 0x25e   : > { %1422 = vst.msk [vmem:[%s2469_s23 + $0x40] sm:$0xff] %vm362_vm0, %v1390_v38 }
 0x25f   : > { %v584_v58 = vpop.f32.mrf.mxu3 }
 0x260   : > { %v1218_v41 = vpop.trf.xlu0 }
 0x261   : > { %v1154_v42 = vpop.trf.xlu1  ;;  %v1367_v43 = vadd.f32 %v1218_v41, %v2486_v4 }
 0x262   : > { %v1359_v44 = vadd.f32 %v1154_v42, %v2484_v0 }
 0x263   : > { %v1399_v46 = vadd.f32 %v1367_v43, %v2479_v62 }
 0x264   : > { %v1391_v47 = vadd.f32 %v1359_v44, %v2479_v62 }
 0x265   : > { %1431 = vst.msk [vmem:[%s2469_s23 + $0x88] sm:$0xff] %vm362_vm0, %v1399_v46 }
 0x266   : > { %1423 = vst.msk [vmem:[%s2469_s23 + $0x48] sm:$0xff] %vm362_vm0, %v1391_v47 }
 0x267   : > { %v587_v8 = vpop.f32.mrf.mxu3 }
 0x268   : > { %v1219_v50 = vpop.trf.xlu0 }
 0x269   : > { %v1155_v51 = vpop.trf.xlu1  ;;  %v1368_v52 = vadd.f32 %v1219_v50, %v2498_v13 }
 0x26a   : > { %v1360_v53 = vadd.f32 %v1155_v51, %v2493_v7 }
 0x26b   : > { %v1400_v54 = vadd.f32 %v1368_v52, %v2488_v5 }
 0x26c   : > { %v1392_v55 = vadd.f32 %v1360_v53, %v2488_v5 }
 0x26d   : > { %1432 = vst.msk [vmem:[%s2469_s23 + $0x90] sm:$0xff] %vm362_vm0, %v1400_v54 }
 0x26e   : > { %v1185_v56 = vpop.trf.xlu2  ;;  %1424 = vst.msk [vmem:[%s2469_s23 + $0x50] sm:$0xff] %vm362_vm0, %v1392_v55 }
 0x26f   : > { %v1362_v57 = vadd.f32 %v1185_v56, %v548_v19  ;;  %v590_v17 = vpop.f32.mrf.mxu3 }
 0x270   : > { %v1220_v60 = vpop.trf.xlu0 }
 0x271   : > { %v1394_v59 = vadd.f32 %v1362_v57, %v2462_v49  ;;  %v1156_v61 = vpop.trf.xlu1  ;;  %v1369_v63 = vadd.f32 %v1220_v60, %v2510_v18 }
 0x272   : > { %v1361_v0 = vadd.f32 %v1156_v61, %v2502_v14 }
 0x273   : > { %1426 = vst.msk [vmem:[%s2469_s23 + $0x60] sm:$0xff] %vm362_vm0, %v1394_v59  ;;  %v1401_v1 = vadd.f32 %v1369_v63, %v2495_v11 }
 0x274   : > { %v1393_v2 = vadd.f32 %v1361_v0, %v2495_v11 }
 0x275   : > { %1433 = vst.msk [vmem:[%s2469_s23 + $0x98] sm:$0xff] %vm362_vm0, %v1401_v1 }
 0x276   : > { %v1186_v3 = vpop.trf.xlu2  ;;  %1425 = vst.msk [vmem:[%s2469_s23 + $0x58] sm:$0xff] %vm362_vm0, %v1393_v2 }
 0x277   : > { %v1363_v4 = vadd.f32 %v1186_v3, %v551_v24  ;;  %v593_v25 = vpop.f32.mrf.mxu3 }
 0x279   : > { %v1395_v6 = vadd.f32 %v1363_v4, %v2479_v62  ;;  %v1249_v7 = vpop.trf.xlu1 }
 0x27a   : > { %v1370_v9 = vadd.f32 %v1249_v7, %v572_v23 }
 0x27b   : > { %1427 = vst.msk [vmem:[%s2469_s23 + $0x68] sm:$0xff] %vm362_vm0, %v1395_v6 }
 0x27c   : > { %v1402_v10 = vadd.f32 %v1370_v9, %v2462_v49 }
 0x27e   : > { %1434 = vst.msk [vmem:[%s2469_s23 + $0xa0] sm:$0xff] %vm362_vm0, %v1402_v10  ;;  %v1187_v12 = vpop.trf.xlu2 }
 0x27f   : > { %v1364_v13 = vadd.f32 %v1187_v12, %v554_v28  ;;  %v596_v34 = vpop.f32.mrf.mxu3 }
 0x281   : > { %v1396_v14 = vadd.f32 %v1364_v13, %v2488_v5  ;;  %v1250_v15 = vpop.trf.xlu1 }
 0x282   : > { %v1371_v16 = vadd.f32 %v1250_v15, %v575_v30 }
 0x283   : > { %1428 = vst.msk [vmem:[%s2469_s23 + $0x70] sm:$0xff] %vm362_vm0, %v1396_v14 }
 0x284   : > { %v1403_v18 = vadd.f32 %v1371_v16, %v2479_v62 }
 0x286   : > { %1435 = vst.msk [vmem:[%s2469_s23 + $0xa8] sm:$0xff] %vm362_vm0, %v1403_v18  ;;  %v1188_v19 = vpop.trf.xlu2 }
 0x287   : > { %v1365_v20 = vadd.f32 %v1188_v19, %v557_v33  ;;  %v599_v41 = vpop.f32.mrf.mxu3 }
 0x289   : > { %v1397_v21 = vadd.f32 %v1365_v20, %v2495_v11  ;;  %v1251_v22 = vpop.trf.xlu1 }
 0x28a   : > { %v1372_v23 = vadd.f32 %v1251_v22, %v578_v37 }
 0x28b   : > { %1429 = vst.msk [vmem:[%s2469_s23 + $0x78] sm:$0xff] %vm362_vm0, %v1397_v21 }
 0x28c   : > { %v1404_v24 = vadd.f32 %v1372_v23, %v2488_v5 }
 0x28e   : > { %1436 = vst.msk [vmem:[%s2469_s23 + $0xb0] sm:$0xff] %vm362_vm0, %v1404_v24  ;;  %v1281_v26 = vpop.trf.xlu2 }
 0x28f   : > { %v1374_v27 = vadd.f32 %v1281_v26, %v584_v58  ;;  %v602_v50 = vpop.f32.mrf.mxu3 }
 0x291   : > { %v1406_v28 = vadd.f32 %v1374_v27, %v2462_v49  ;;  %v1252_v29 = vpop.trf.xlu1 }
 0x292   : > { %v1373_v30 = vadd.f32 %v1252_v29, %v581_v48 }
 0x293   : > { %1438 = vst.msk [vmem:[%s2469_s23 + $0xc0] sm:$0xff] %vm362_vm0, %v1406_v28 }
 0x294   : > { %v1405_v31 = vadd.f32 %v1373_v30, %v2495_v11 }
 0x296   : > { %1437 = vst.msk [vmem:[%s2469_s23 + $0xb8] sm:$0xff] %vm362_vm0, %v1405_v31  ;;  %v1282_v32 = vpop.trf.xlu2 }
 0x297   : > { %v1375_v33 = vadd.f32 %v1282_v32, %v587_v8 }
 0x299   : > { %v1407_v35 = vadd.f32 %v1375_v33, %v2479_v62 }
 0x29b   : > { %1439 = vst.msk [vmem:[%s2469_s23 + $0xc8] sm:$0xff] %vm362_vm0, %v1407_v35 }
 0x29e   : > { %v1283_v36 = vpop.trf.xlu2 }
 0x29f   : > { %v1376_v37 = vadd.f32 %v1283_v36, %v590_v17  ;;  %v1313_v38 = vpop.trf.xlu0 }
 0x2a0   : > { %v1378_v39 = vadd.f32 %v1313_v38, %v596_v34 }
 0x2a1   : > { %v1408_v40 = vadd.f32 %v1376_v37, %v2488_v5 }
 0x2a2   : > { %v1410_v42 = vadd.f32 %v1378_v39, %v2462_v49 }
 0x2a3   : > { %1440 = vst.msk [vmem:[%s2469_s23 + $0xd0] sm:$0xff] %vm362_vm0, %v1408_v40 }
 0x2a4   : > { %1442 = vst.msk [vmem:[%s2469_s23 + $0xe0] sm:$0xff] %vm362_vm0, %v1410_v42 }
 0x2a6   : > { %v1284_v43 = vpop.trf.xlu2 }
 0x2a7   : > { %v1377_v44 = vadd.f32 %v1284_v43, %v593_v25  ;;  %v1314_v45 = vpop.trf.xlu0 }
 0x2a8   : > { %v1379_v46 = vadd.f32 %v1314_v45, %v599_v41 }
 0x2a9   : > { %v1409_v47 = vadd.f32 %v1377_v44, %v2495_v11 }
 0x2aa   : > { %v1411_v48 = vadd.f32 %v1379_v46, %v2479_v62  ;;  %v605_v62 = vpop.f32.mrf.mxu3 }
 0x2ab   : > { %1441 = vst.msk [vmem:[%s2469_s23 + $0xd8] sm:$0xff] %vm362_vm0, %v1409_v47 }
 0x2ac   : > { %1443 = vst.msk [vmem:[%s2469_s23 + $0xe8] sm:$0xff] %vm362_vm0, %v1411_v48 }
 0x2af   : > { %v1315_v49 = vpop.trf.xlu0 }
 0x2b0   : > { %v1380_v51 = vadd.f32 %v1315_v49, %v602_v50 }
 0x2b2   : > { %v1412_v52 = vadd.f32 %v1380_v51, %v2488_v5 }
 0x2b4   : > { %1444 = vst.msk [vmem:[%s2469_s23 + $0xf0] sm:$0xff] %vm362_vm0, %v1412_v52 }
 0x2b7   : > { %v1316_v53 = vpop.trf.xlu0 }
 0x2b8   : > { %v1381_v54 = vadd.f32 %v1316_v53, %v605_v62 }
 0x2ba   : > { %v1413_v55 = vadd.f32 %v1381_v54, %v2495_v11 }
 0x2bc   : > { %1445 = vst.msk [vmem:[%s2469_s23 + $0xf8] sm:$0xff] %vm362_vm0, %v1413_v55 }
 0x2bd   : > { %2001 = shalt.err (!%p1998_p8)
}
 0x2be   : > { %s2058_s20 = smov 128   ;;  %s2059_s23 = smov 8  }
 0x2bf   : > { %1755 = dma.vmem_to_hbm [thread:$0]  (%p2166_p7), %s1480_s17, 4096, %s1482_s16, %s1452_s22, %s2058_s20, %s2058_s20, %s2059_s23  }
 0x2c0 PF: > { %s1496_s7 = sand.u32 1, %s2040_s18   ;;  %p2678_p9 = scmp.ge.s32.totalorder %s2052_s21, 2 }
 0x2c1   : > { %s1497_s13 = scalar_lea.sflag [#allocation4], %s1496_s7 }
 0x2c2   : > { %p1773_p2 = pnand %p2678_p9, %p2125_p6 }
 0x2c4   : > { %p1774_p13 = pneg %p1773_p2 }
 0x2c6   : > { %2031 = dma.done.wait (%p1774_p13), %s1497_s13, 128  }
 0x2c7   : > { %2033 = vsyncadd (%p1774_p13), %s1497_s13, 4294967168  ;;  %s1507_s1 = scalar_lea.sflag [#allocation11], %s1496_s7 }
 0x2c8   : > { %2035 = dma.done.wait (%p1774_p13), %s1507_s1, 4096  }
 0x2c9   : > { %2037 = vsyncadd (%p1774_p13), %s1507_s1, 4294963200  ;;  %s2679_s29 = sld [smem:[#allocation17_spill]]  ;;  %p21_p7 = scmp.ge.s32.totalorder %s2147_s8, 4  }
 0x2ca   : > { %s2680_s20 = sld [smem:[#allocation18_spill]]  ;;  %s2681_s18 = smov %s2044_s19 }
 0x2cb   : > { %s2683_s21 = smov %s2147_s8  ;;  %23 = sbr.rel (!%p21_p7) target bundleno = 10 (0xa), region = 116 }
 0x2cf   : > { %s2682_s19 = smov %s2679_s29 }
 0x2d0   :  { %1513 = vsyncpa [#allocation3], 1 }
 0x2d1   :  { %1515 = vsyncpa [#allocation3 + $0x1], 1 }
 0x2d2   :  { %1516 = vsyncpa [#allocation6], 1 }
 0x2d3   :  { %1517 = vsyncpa [#allocation4], 1 }
 0x2d4   :  { %1519 = vsyncpa [#allocation4 + $0x1], 1 }
 0x2d5   :  { %1520 = vsyncpa [#allocation11], 1 }
 0x2d6   :  { %1522 = vsyncpa [#allocation11 + $0x1], 1 }

</bundles_post_ra>
